<compile_context>
chip_gen: v7x
topology: tpu7x:2x2x1
jax: 0.10.0
libtpu: 0.0.40
codegen_flags: <defaults>
</compile_context>

<pallas_src>
import functools

import jax
import jax.numpy as jnp
from jax import lax
from jax.experimental import pallas as pl
from jax.experimental.pallas import tpu as pltpu


_MASK_NONE = 0
_MASK_EXPLICIT = 1
_MASK_CAUSAL = 2


# ----------------------------- Pallas kernel ------------------------------- #

def _attn_fused_kernel(num_heads, head_dim, mask_mode, compute_dtype, *refs):
    """One (Bblk, T, E) tile: fused QKV + per-head softmax attention + proj."""
    if mask_mode == _MASK_EXPLICIT:
        x_ref, wqkv_ref, bqkv_ref, wp_ref, bp_ref, mask_ref, o_ref = refs
    else:
        x_ref, wqkv_ref, bqkv_ref, wp_ref, bp_ref, o_ref = refs
        mask_ref = None

    H, D = num_heads, head_dim
    E = H * D
    Bblk, T, _ = x_ref.shape
    R = Bblk * T

    # Flatten batch rows so the QKV matmul fills the MXU M dimension.
    x = x_ref[...].reshape(R, E).astype(compute_dtype)                # (R, E)

    # Single wide bf16 MXU matmul producing Q|K|V for every head at once.
    # (head_dim**-0.5 is pre-folded into the Q block / bias in the wrapper.)
    qkv = (jnp.dot(x, wqkv_ref[...], preferred_element_type=jnp.float32)
           + bqkv_ref[...])                                           # (R, 3E) f32

    q = qkv[:, :E].reshape(Bblk, T, E).astype(compute_dtype)
    k = qkv[:, E:2 * E].reshape(Bblk, T, E).astype(compute_dtype)
    v = qkv[:, 2 * E:].reshape(Bblk, T, E).astype(compute_dtype)

    if mask_mode == _MASK_EXPLICIT:
        add_mask = mask_ref[...]                                      # (T, T) f32
    elif mask_mode == _MASK_CAUSAL:
        # Generate the causal mask in-kernel: no (T, T) HBM DMA, VPU filler only.
        row = lax.broadcasted_iota(jnp.int32, (T, T), 0)
        col = lax.broadcasted_iota(jnp.int32, (T, T), 1)
        add_mask = jnp.where(col <= row, 0.0, -1e9).astype(jnp.float32)
    else:
        add_mask = None

    # Per-head attention, batched over the Bblk rows (static unroll over heads).
    ctx_heads = []
    for h in range(H):
        sl = slice(h * D, (h + 1) * D)
        q_h = q[:, :, sl]                                             # (Bblk, T, D)
        k_h = k[:, :, sl]
        v_h = v[:, :, sl]

        s = lax.dot_general(q_h, k_h, (((2,), (2,)), ((0,), (0,))),
                            preferred_element_type=jnp.float32)       # (Bblk, T, T)
        if add_mask is not None:
            s = s + add_mask
        s = s - jnp.max(s, axis=-1, keepdims=True)
        p = jnp.exp(s)
        l = jnp.sum(p, axis=-1, keepdims=True)                        # (Bblk, T, 1)

        # attn_drop is identity (p=0.0).  Softmax normalization deferred to the
        # (T, D) context; exact reciprocal (approx reciprocal failed 2e-5 parity).
        ctx_h = lax.dot_general(p.astype(compute_dtype), v_h,
                                (((2,), (1,)), ((0,), (0,))),
                                preferred_element_type=jnp.float32)   # (Bblk, T, D)
        ctx_heads.append(ctx_h * pl.reciprocal(l, approx=False))

    ctx = jnp.concatenate(ctx_heads, axis=-1)                         # (Bblk, T, E)
    ctx2d = ctx.reshape(R, E).astype(compute_dtype)

    # Fused output projection epilogue (ctx never leaves VMEM).
    out = (jnp.dot(ctx2d, wp_ref[...], preferred_element_type=jnp.float32)
           + bp_ref[...])                                             # (R, E) f32
    o_ref[...] = out.reshape(Bblk, T, E).astype(o_ref.dtype)


# ------------------------------- wrappers ----------------------------------- #

def fuse_attention_params(params, num_heads, compute_dtype=jnp.bfloat16):
    """Build the fused (E,3E)/(E,E) weights once per parameter set (hoisted)."""
    E = params["wp"].shape[0]
    H = num_heads
    D = E // H
    scale = D ** -0.5
    eye_h = jnp.eye(H, dtype=jnp.float32)

    def block_diag_head_weight(w):
        # w: (E, D) torch Linear layout (out_features = H*D, in_features = D).
        # Per head i the module computes x_i @ w[i*D:(i+1)*D, :].T, i.e. a
        # block-diagonal (E, E) projection of the full (T, E) activation.
        wht = jnp.transpose(w.reshape(H, D, D), (0, 2, 1))            # (H, Din, Dout)
        return jnp.einsum("hij,hg->higj", wht, eye_h).reshape(E, E)

    wq_bd = block_diag_head_weight(params["wq"]) * scale   # fold q-scale into W/b
    wk_bd = block_diag_head_weight(params["wk"])
    wv_bd = block_diag_head_weight(params["wv"])
    w_qkv = jnp.concatenate([wq_bd, wk_bd, wv_bd], axis=1).astype(compute_dtype)
    b_qkv = jnp.concatenate(
        [params["bq"] * scale, params["bk"], params["bv"]]
    ).reshape(1, 3 * E).astype(jnp.float32)                # biases stay f32
    w_p = params["wp"].T.astype(compute_dtype)
    b_p = params["bp"].reshape(1, E).astype(jnp.float32)
    return {"w_qkv": w_qkv, "b_qkv": b_qkv, "w_p": w_p, "b_p": b_p}


def attention_forward(x, fused, num_heads, mask=None, causal=False, block_b=None):
    assert not (causal and mask is not None), "pass either causal=True or mask"
    B, T, E = x.shape
    H = num_heads
    D = E // H
    dtype = x.dtype
    compute_dtype = fused["w_qkv"].dtype

    # Batch rows per grid step: aim for >=256 MXU rows, keep B divisible.
    if block_b is None:
        block_b = max(1, min(B, pl.cdiv(256, T)))
    while B % block_b:
        block_b -= 1
    Bblk = block_b

    if mask is not None:
        mask_mode = _MASK_EXPLICIT
    elif causal:
        mask_mode = _MASK_CAUSAL
    else:
        mask_mode = _MASK_NONE

    inputs = [x, fused["w_qkv"], fused["b_qkv"], fused["w_p"], fused["b_p"]]
    in_specs = [
        pl.BlockSpec((Bblk, T, E), lambda b: (b, 0, 0)),    # x tile (Bblk, T, E)
        pl.BlockSpec((E, 3 * E), lambda b: (0, 0)),         # fused QKV W (resident)
        pl.BlockSpec((1, 3 * E), lambda b: (0, 0)),         # fused QKV bias (f32)
        pl.BlockSpec((E, E), lambda b: (0, 0)),             # proj W (resident)
        pl.BlockSpec((1, E), lambda b: (0, 0)),             # proj bias (f32)
    ]
    if mask_mode == _MASK_EXPLICIT:
        inputs.append(mask.astype(jnp.float32))
        in_specs.append(pl.BlockSpec((T, T), lambda b: (0, 0)))

    kernel = functools.partial(_attn_fused_kernel, H, D, mask_mode, compute_dtype)
    return pl.pallas_call(
        kernel,
        out_shape=jax.ShapeDtypeStruct((B, T, E), dtype),
        grid_spec=pltpu.PrefetchScalarGridSpec(
            num_scalar_prefetch=0,
            grid=(B // Bblk,),
            in_specs=in_specs,
            out_specs=pl.BlockSpec((Bblk, T, E), lambda b: (b, 0, 0)),
        ),
        compiler_params=pltpu.CompilerParams(
            dimension_semantics=("parallel",),
            vmem_limit_bytes=32 * 1024 * 1024),
    )(*inputs)


# --------------------------- pure-JAX reference ----------------------------- #

def attention_reference(x, params, num_heads, mask=None):
    B, T, E = x.shape
    H = num_heads
    D = E // H
    scale = D ** -0.5
    xh = x.reshape(B, T, H, D)                                        # (B,T,H,D)

    def proj_heads(w, b):
        wh = w.reshape(H, D, D)                                       # (H, out, in)
        return (jnp.einsum("bthd,hed->bhte", xh, wh)
                + b.reshape(1, H, 1, D))                              # (B,H,T,D)

    q = proj_heads(params["wq"], params["bq"]) * scale
    k = proj_heads(params["wk"], params["bk"])
    v = proj_heads(params["wv"], params["bv"])
    attn = jnp.einsum("bhte,bhse->bhts", q.astype(jnp.float32),
                      k.astype(jnp.float32))
    if mask is not None:
        attn = attn + mask
    attn = jax.nn.softmax(attn, axis=-1).astype(x.dtype)
    ctx = jnp.einsum("bhts,bhsd->bhtd", attn, v)
    ctx = ctx.transpose(0, 2, 1, 3).reshape(B, T, E)
    return ctx @ params["wp"].T + params["bp"]


# --------------------------------- main ------------------------------------ #

def init_params(key, dim, num_heads):
    D = dim // num_heads
    ks = jax.random.split(key, 8)
    s = 0.02
    return {
        "wq": s * jax.random.normal(ks[0], (dim, D), jnp.float32),
        "bq": s * jax.random.normal(ks[1], (dim,), jnp.float32),
        "wk": s * jax.random.normal(ks[2], (dim, D), jnp.float32),
        "bk": s * jax.random.normal(ks[3], (dim,), jnp.float32),
        "wv": s * jax.random.normal(ks[4], (dim, D), jnp.float32),
        "bv": s * jax.random.normal(ks[5], (dim,), jnp.float32),
        "wp": s * jax.random.normal(ks[6], (dim, dim), jnp.float32),
        "bp": s * jax.random.normal(ks[7], (dim,), jnp.float32),
    }


if __name__ == "__main__":
    B, T, dim, num_heads = 2, 8, 32, 4     # head_dim = 8

    key = jax.random.PRNGKey(0)
    k_x, k_p = jax.random.split(key)
    x = jax.random.normal(k_x, (B, T, dim), jnp.float32)
    params = init_params(k_p, dim, num_heads)

    causal = jnp.where(jnp.tril(jnp.ones((T, T), bool)), 0.0, -1e9).astype(jnp.float32)
    ref = attention_reference(x, params, num_heads)
    ref_m = attention_reference(x, params, num_heads, mask=causal)

    # Weight fusion hoisted: built once per (params, compute_dtype).
    fused_bf16 = fuse_attention_params(params, num_heads, jnp.bfloat16)
    fused_f32 = fuse_attention_params(params, num_heads, jnp.float32)

    # 1) No-mask path, bf16 MXU matmuls (f32 accumulate / softmax).
    out = jax.block_until_ready(attention_forward(x, fused_bf16, num_heads))
    assert out.shape == (B, T, dim)
    err = float(jnp.max(jnp.abs(out - ref)))
    assert err < 3e-3, f"no-mask (bf16) max abs err {err}"

    # 2) Causal mask generated in-kernel (no (T,T) mask DMA), bf16 matmuls.
    out_c = jax.block_until_ready(
        attention_forward(x, fused_bf16, num_heads, causal=True))
    err_c = float(jnp.max(jnp.abs(out_c - ref_m)))
    assert err_c < 3e-3, f"causal (bf16) max abs err {err_c}"

    # 3) Explicit mask array path, f32 compute for tight parity with reference.
    out_m = jax.block_until_ready(
        attention_forward(x, fused_f32, num_heads, mask=causal))
    err_m = float(jnp.max(jnp.abs(out_m - ref_m)))
    assert err_m < 1e-4, f"masked (f32) max abs err {err_m}"

    print("KERNEL_OK")
</pallas_src>

<mosaic_0001>
module attributes {stable_mosaic.version = 11 : i64} {
  func.func @_attn_fused_kernel(%arg0: i32, %arg1: memref<2x8x32xf32, #tpu.memory_space<vmem>>, %arg2: memref<32x96xbf16, #tpu.memory_space<vmem>>, %arg3: memref<1x96xf32, #tpu.memory_space<vmem>>, %arg4: memref<32x32xbf16, #tpu.memory_space<vmem>>, %arg5: memref<1x32xf32, #tpu.memory_space<vmem>>, %arg6: memref<2x8x32xf32, #tpu.memory_space<vmem>>) attributes {dimension_semantics = [#tpu.dimension_semantics<parallel>], iteration_bounds = array<i64: 1>, scalar_prefetch = 0 : i64, scratch_operands = 0 : i64, tpu.core_type = #tpu.core_type<tc>, window_params = [{transform_indices = @transform_0, window_bounds = array<i64: 2, 8, 32>}, {pipeline_mode = #tpu.pipeline_mode<synchronous>, transform_indices = @transform_1, window_bounds = array<i64: 32, 96>}, {pipeline_mode = #tpu.pipeline_mode<synchronous>, transform_indices = @transform_2, window_bounds = array<i64: 1, 96>}, {pipeline_mode = #tpu.pipeline_mode<synchronous>, transform_indices = @transform_3, window_bounds = array<i64: 32, 32>}, {pipeline_mode = #tpu.pipeline_mode<synchronous>, transform_indices = @transform_4, window_bounds = array<i64: 1, 32>}, {transform_indices = @transform_5, window_bounds = array<i64: 2, 8, 32>}]} {
    %c0 = arith.constant 0 : index
    %c0_0 = arith.constant 0 : index
    %c0_1 = arith.constant 0 : index
    %0 = vector.load %arg1[%c0, %c0_0, %c0_1] : memref<2x8x32xf32, #tpu.memory_space<vmem>>, vector<2x8x32xf32>
    %1 = vector.shape_cast %0 : vector<2x8x32xf32> to vector<16x32xf32>
    %2 = arith.truncf %1 : vector<16x32xf32> to vector<16x32xbf16>
    %c0_2 = arith.constant 0 : index
    %c0_3 = arith.constant 0 : index
    %3 = vector.load %arg2[%c0_2, %c0_3] : memref<32x96xbf16, #tpu.memory_space<vmem>>, vector<32x96xbf16>
    %cst = arith.constant dense<0.000000e+00> : vector<16x96xf32>
    %4 = tpu.matmul %2, %3, %cst {dimension_numbers = #tpu.dot_dimension_numbers<[1], [0], [0], [1], [0, 0, 1, 1], [], []>} : vector<16x32xbf16>, vector<32x96xbf16>, vector<16x96xf32> -> vector<16x96xf32>
    %c0_4 = arith.constant 0 : index
    %c0_5 = arith.constant 0 : index
    %5 = vector.load %arg3[%c0_4, %c0_5] : memref<1x96xf32, #tpu.memory_space<vmem>>, vector<1x96xf32>
    %6 = vector.broadcast %5 : vector<1x96xf32> to vector<16x96xf32>
    %7 = arith.addf %4, %6 : vector<16x96xf32>
    %8 = vector.extract_strided_slice %7 {offsets = [0, 0], sizes = [16, 32], strides = [1, 1]} : vector<16x96xf32> to vector<16x32xf32>
    %9 = vector.shape_cast %8 : vector<16x32xf32> to vector<2x8x32xf32>
    %10 = arith.truncf %9 : vector<2x8x32xf32> to vector<2x8x32xbf16>
    %11 = vector.extract_strided_slice %7 {offsets = [0, 32], sizes = [16, 32], strides = [1, 1]} : vector<16x96xf32> to vector<16x32xf32>
    %12 = vector.shape_cast %11 : vector<16x32xf32> to vector<2x8x32xf32>
    %13 = arith.truncf %12 : vector<2x8x32xf32> to vector<2x8x32xbf16>
    %14 = vector.extract_strided_slice %7 {offsets = [0, 64], sizes = [16, 32], strides = [1, 1]} : vector<16x96xf32> to vector<16x32xf32>
    %15 = vector.shape_cast %14 : vector<16x32xf32> to vector<2x8x32xf32>
    %16 = arith.truncf %15 : vector<2x8x32xf32> to vector<2x8x32xbf16>
    %17 = vector.extract_strided_slice %10 {offsets = [0, 0, 0], sizes = [2, 8, 8], strides = [1, 1, 1]} : vector<2x8x32xbf16> to vector<2x8x8xbf16>
    %18 = vector.extract_strided_slice %13 {offsets = [0, 0, 0], sizes = [2, 8, 8], strides = [1, 1, 1]} : vector<2x8x32xbf16> to vector<2x8x8xbf16>
    %19 = vector.extract_strided_slice %16 {offsets = [0, 0, 0], sizes = [2, 8, 8], strides = [1, 1, 1]} : vector<2x8x32xbf16> to vector<2x8x8xbf16>
    %cst_6 = arith.constant dense<0.000000e+00> : vector<2x8x8xf32>
    %20 = tpu.matmul %17, %18, %cst_6 {dimension_numbers = #tpu.dot_dimension_numbers<[2], [2], [1], [1], [0, 0, 0, 1, 1, 1], [0], [0]>} : vector<2x8x8xbf16>, vector<2x8x8xbf16>, vector<2x8x8xf32> -> vector<2x8x8xf32>
    %cst_7 = arith.constant dense<0xFF800000> : vector<2x8xf32>
    %21 = vector.multi_reduction <maximumf>, %20, %cst_7 [2] : vector<2x8x8xf32> to vector<2x8xf32>
    %22 = vector.shape_cast %21 : vector<2x8xf32> to vector<2x8x1xf32>
    %23 = vector.broadcast %22 : vector<2x8x1xf32> to vector<2x8x8xf32>
    %24 = arith.subf %20, %23 : vector<2x8x8xf32>
    %25 = math.exp %24 : vector<2x8x8xf32>
    %cst_8 = arith.constant dense<0.000000e+00> : vector<2x8xf32>
    %26 = vector.multi_reduction <add>, %25, %cst_8 [2] : vector<2x8x8xf32> to vector<2x8xf32>
    %27 = vector.shape_cast %26 : vector<2x8xf32> to vector<2x8x1xf32>
    %28 = arith.truncf %25 : vector<2x8x8xf32> to vector<2x8x8xbf16>
    %cst_9 = arith.constant dense<0.000000e+00> : vector<2x8x8xf32>
    %29 = tpu.matmul %28, %19, %cst_9 {dimension_numbers = #tpu.dot_dimension_numbers<[2], [1], [1], [2], [0, 0, 0, 1, 1, 2], [0], [0]>} : vector<2x8x8xbf16>, vector<2x8x8xbf16>, vector<2x8x8xf32> -> vector<2x8x8xf32>
    %30 = tpu.reciprocal %27 : vector<2x8x1xf32> -> vector<2x8x1xf32>
    %31 = vector.broadcast %30 : vector<2x8x1xf32> to vector<2x8x8xf32>
    %32 = arith.mulf %29, %31 : vector<2x8x8xf32>
    %33 = vector.extract_strided_slice %10 {offsets = [0, 0, 8], sizes = [2, 8, 8], strides = [1, 1, 1]} : vector<2x8x32xbf16> to vector<2x8x8xbf16>
    %34 = vector.extract_strided_slice %13 {offsets = [0, 0, 8], sizes = [2, 8, 8], strides = [1, 1, 1]} : vector<2x8x32xbf16> to vector<2x8x8xbf16>
    %35 = vector.extract_strided_slice %16 {offsets = [0, 0, 8], sizes = [2, 8, 8], strides = [1, 1, 1]} : vector<2x8x32xbf16> to vector<2x8x8xbf16>
    %cst_10 = arith.constant dense<0.000000e+00> : vector<2x8x8xf32>
    %36 = tpu.matmul %33, %34, %cst_10 {dimension_numbers = #tpu.dot_dimension_numbers<[2], [2], [1], [1], [0, 0, 0, 1, 1, 1], [0], [0]>} : vector<2x8x8xbf16>, vector<2x8x8xbf16>, vector<2x8x8xf32> -> vector<2x8x8xf32>
    %cst_11 = arith.constant dense<0xFF800000> : vector<2x8xf32>
    %37 = vector.multi_reduction <maximumf>, %36, %cst_11 [2] : vector<2x8x8xf32> to vector<2x8xf32>
    %38 = vector.shape_cast %37 : vector<2x8xf32> to vector<2x8x1xf32>
    %39 = vector.broadcast %38 : vector<2x8x1xf32> to vector<2x8x8xf32>
    %40 = arith.subf %36, %39 : vector<2x8x8xf32>
    %41 = math.exp %40 : vector<2x8x8xf32>
    %cst_12 = arith.constant dense<0.000000e+00> : vector<2x8xf32>
    %42 = vector.multi_reduction <add>, %41, %cst_12 [2] : vector<2x8x8xf32> to vector<2x8xf32>
    %43 = vector.shape_cast %42 : vector<2x8xf32> to vector<2x8x1xf32>
    %44 = arith.truncf %41 : vector<2x8x8xf32> to vector<2x8x8xbf16>
    %cst_13 = arith.constant dense<0.000000e+00> : vector<2x8x8xf32>
    %45 = tpu.matmul %44, %35, %cst_13 {dimension_numbers = #tpu.dot_dimension_numbers<[2], [1], [1], [2], [0, 0, 0, 1, 1, 2], [0], [0]>} : vector<2x8x8xbf16>, vector<2x8x8xbf16>, vector<2x8x8xf32> -> vector<2x8x8xf32>
    %46 = tpu.reciprocal %43 : vector<2x8x1xf32> -> vector<2x8x1xf32>
    %47 = vector.broadcast %46 : vector<2x8x1xf32> to vector<2x8x8xf32>
    %48 = arith.mulf %45, %47 : vector<2x8x8xf32>
    %49 = vector.extract_strided_slice %10 {offsets = [0, 0, 16], sizes = [2, 8, 8], strides = [1, 1, 1]} : vector<2x8x32xbf16> to vector<2x8x8xbf16>
    %50 = vector.extract_strided_slice %13 {offsets = [0, 0, 16], sizes = [2, 8, 8], strides = [1, 1, 1]} : vector<2x8x32xbf16> to vector<2x8x8xbf16>
    %51 = vector.extract_strided_slice %16 {offsets = [0, 0, 16], sizes = [2, 8, 8], strides = [1, 1, 1]} : vector<2x8x32xbf16> to vector<2x8x8xbf16>
    %cst_14 = arith.constant dense<0.000000e+00> : vector<2x8x8xf32>
    %52 = tpu.matmul %49, %50, %cst_14 {dimension_numbers = #tpu.dot_dimension_numbers<[2], [2], [1], [1], [0, 0, 0, 1, 1, 1], [0], [0]>} : vector<2x8x8xbf16>, vector<2x8x8xbf16>, vector<2x8x8xf32> -> vector<2x8x8xf32>
    %cst_15 = arith.constant dense<0xFF800000> : vector<2x8xf32>
    %53 = vector.multi_reduction <maximumf>, %52, %cst_15 [2] : vector<2x8x8xf32> to vector<2x8xf32>
    %54 = vector.shape_cast %53 : vector<2x8xf32> to vector<2x8x1xf32>
    %55 = vector.broadcast %54 : vector<2x8x1xf32> to vector<2x8x8xf32>
    %56 = arith.subf %52, %55 : vector<2x8x8xf32>
    %57 = math.exp %56 : vector<2x8x8xf32>
    %cst_16 = arith.constant dense<0.000000e+00> : vector<2x8xf32>
    %58 = vector.multi_reduction <add>, %57, %cst_16 [2] : vector<2x8x8xf32> to vector<2x8xf32>
    %59 = vector.shape_cast %58 : vector<2x8xf32> to vector<2x8x1xf32>
    %60 = arith.truncf %57 : vector<2x8x8xf32> to vector<2x8x8xbf16>
    %cst_17 = arith.constant dense<0.000000e+00> : vector<2x8x8xf32>
    %61 = tpu.matmul %60, %51, %cst_17 {dimension_numbers = #tpu.dot_dimension_numbers<[2], [1], [1], [2], [0, 0, 0, 1, 1, 2], [0], [0]>} : vector<2x8x8xbf16>, vector<2x8x8xbf16>, vector<2x8x8xf32> -> vector<2x8x8xf32>
    %62 = tpu.reciprocal %59 : vector<2x8x1xf32> -> vector<2x8x1xf32>
    %63 = vector.broadcast %62 : vector<2x8x1xf32> to vector<2x8x8xf32>
    %64 = arith.mulf %61, %63 : vector<2x8x8xf32>
    %65 = vector.extract_strided_slice %10 {offsets = [0, 0, 24], sizes = [2, 8, 8], strides = [1, 1, 1]} : vector<2x8x32xbf16> to vector<2x8x8xbf16>
    %66 = vector.extract_strided_slice %13 {offsets = [0, 0, 24], sizes = [2, 8, 8], strides = [1, 1, 1]} : vector<2x8x32xbf16> to vector<2x8x8xbf16>
    %67 = vector.extract_strided_slice %16 {offsets = [0, 0, 24], sizes = [2, 8, 8], strides = [1, 1, 1]} : vector<2x8x32xbf16> to vector<2x8x8xbf16>
    %cst_18 = arith.constant dense<0.000000e+00> : vector<2x8x8xf32>
    %68 = tpu.matmul %65, %66, %cst_18 {dimension_numbers = #tpu.dot_dimension_numbers<[2], [2], [1], [1], [0, 0, 0, 1, 1, 1], [0], [0]>} : vector<2x8x8xbf16>, vector<2x8x8xbf16>, vector<2x8x8xf32> -> vector<2x8x8xf32>
    %cst_19 = arith.constant dense<0xFF800000> : vector<2x8xf32>
    %69 = vector.multi_reduction <maximumf>, %68, %cst_19 [2] : vector<2x8x8xf32> to vector<2x8xf32>
    %70 = vector.shape_cast %69 : vector<2x8xf32> to vector<2x8x1xf32>
    %71 = vector.broadcast %70 : vector<2x8x1xf32> to vector<2x8x8xf32>
    %72 = arith.subf %68, %71 : vector<2x8x8xf32>
    %73 = math.exp %72 : vector<2x8x8xf32>
    %cst_20 = arith.constant dense<0.000000e+00> : vector<2x8xf32>
    %74 = vector.multi_reduction <add>, %73, %cst_20 [2] : vector<2x8x8xf32> to vector<2x8xf32>
    %75 = vector.shape_cast %74 : vector<2x8xf32> to vector<2x8x1xf32>
    %76 = arith.truncf %73 : vector<2x8x8xf32> to vector<2x8x8xbf16>
    %cst_21 = arith.constant dense<0.000000e+00> : vector<2x8x8xf32>
    %77 = tpu.matmul %76, %67, %cst_21 {dimension_numbers = #tpu.dot_dimension_numbers<[2], [1], [1], [2], [0, 0, 0, 1, 1, 2], [0], [0]>} : vector<2x8x8xbf16>, vector<2x8x8xbf16>, vector<2x8x8xf32> -> vector<2x8x8xf32>
    %78 = tpu.reciprocal %75 : vector<2x8x1xf32> -> vector<2x8x1xf32>
    %79 = vector.broadcast %78 : vector<2x8x1xf32> to vector<2x8x8xf32>
    %80 = arith.mulf %77, %79 : vector<2x8x8xf32>
    %81 = tpu.concatenate %32, %48, %64, %80 in 2 : vector<2x8x8xf32>, vector<2x8x8xf32>, vector<2x8x8xf32>, vector<2x8x8xf32> -> vector<2x8x32xf32>
    %82 = vector.shape_cast %81 : vector<2x8x32xf32> to vector<16x32xf32>
    %83 = arith.truncf %82 : vector<16x32xf32> to vector<16x32xbf16>
    %c0_22 = arith.constant 0 : index
    %c0_23 = arith.constant 0 : index
    %84 = vector.load %arg4[%c0_22, %c0_23] : memref<32x32xbf16, #tpu.memory_space<vmem>>, vector<32x32xbf16>
    %cst_24 = arith.constant dense<0.000000e+00> : vector<16x32xf32>
    %85 = tpu.matmul %83, %84, %cst_24 {dimension_numbers = #tpu.dot_dimension_numbers<[1], [0], [0], [1], [0, 0, 1, 1], [], []>} : vector<16x32xbf16>, vector<32x32xbf16>, vector<16x32xf32> -> vector<16x32xf32>
    %c0_25 = arith.constant 0 : index
    %c0_26 = arith.constant 0 : index
    %86 = vector.load %arg5[%c0_25, %c0_26] : memref<1x32xf32, #tpu.memory_space<vmem>>, vector<1x32xf32>
    %87 = vector.broadcast %86 : vector<1x32xf32> to vector<16x32xf32>
    %88 = arith.addf %85, %87 : vector<16x32xf32>
    %89 = vector.shape_cast %88 : vector<16x32xf32> to vector<2x8x32xf32>
    %c0_27 = arith.constant 0 : index
    %c0_28 = arith.constant 0 : index
    %c0_29 = arith.constant 0 : index
    %90 = vector.load %arg6[%c0_27, %c0_28, %c0_29] : memref<2x8x32xf32, #tpu.memory_space<vmem>>, vector<2x8x32xf32>
    tpu.vector_store %arg6[%c0_27, %c0_28, %c0_29], %89 {strides = array<i32>} : memref<2x8x32xf32, #tpu.memory_space<vmem>>, vector<2x8x32xf32>,
    return
  }
  func.func @transform_0(%arg0: i32) -> (i32, i32, i32) {
    %c0_i32 = arith.constant 0 : i32
    %c0_i32_0 = arith.constant 0 : i32
    %c0_i32_1 = arith.constant 0 : i32
    return %arg0, %c0_i32, %c0_i32_0 : i32, i32, i32
  }
  func.func @transform_1(%arg0: i32) -> (i32, i32) {
    %c0_i32 = arith.constant 0 : i32
    %c0_i32_0 = arith.constant 0 : i32
    %c0_i32_1 = arith.constant 0 : i32
    return %c0_i32, %c0_i32_0 : i32, i32
  }
  func.func @transform_2(%arg0: i32) -> (i32, i32) {
    %c0_i32 = arith.constant 0 : i32
    %c0_i32_0 = arith.constant 0 : i32
    %c0_i32_1 = arith.constant 0 : i32
    return %c0_i32, %c0_i32_0 : i32, i32
  }
  func.func @transform_3(%arg0: i32) -> (i32, i32) {
    %c0_i32 = arith.constant 0 : i32
    %c0_i32_0 = arith.constant 0 : i32
    %c0_i32_1 = arith.constant 0 : i32
    return %c0_i32, %c0_i32_0 : i32, i32
  }
  func.func @transform_4(%arg0: i32) -> (i32, i32) {
    %c0_i32 = arith.constant 0 : i32
    %c0_i32_0 = arith.constant 0 : i32
    %c0_i32_1 = arith.constant 0 : i32
    return %c0_i32, %c0_i32_0 : i32, i32
  }
  func.func @transform_5(%arg0: i32) -> (i32, i32, i32) {
    %c0_i32 = arith.constant 0 : i32
    %c0_i32_0 = arith.constant 0 : i32
    %c0_i32_1 = arith.constant 0 : i32
    return %arg0, %c0_i32, %c0_i32_0 : i32, i32, i32
  }
}

</mosaic_0001>

<bundles_post_ra>
// kernel: tpu_custom_call.1
= control target key start
LH: loop header
LB: loop body
LE: loop exit
PB: predicated region body
PF: predicated region fallthrough
CT: control target
= control target key end

     0   :  { %10 = vsyncpa [#allocation3], 0  ;;  %s1776_s0 = inlined_call_operand.hbm [shape: f32[2,8,32], index: 0, kind: input, shape index: {}]   ;;  %s1777_s1 = inlined_call_operand.hbm [shape: bf16[32,96], index: 1, kind: input, shape index: {}]   ;;  %s1778_s2 = inlined_call_operand.vmem [shape: f32[1,96], index: 2, kind: input, shape index: {}]   ;;  %s1779_s3 = inlined_call_operand.hbm [shape: bf16[32,32], index: 3, kind: input, shape index: {}]   ;;  %s1780_s4 = inlined_call_operand.vmem [shape: f32[1,32], index: 4, kind: input, shape index: {}]   ;;  %s1781_s5 = inlined_call_operand.hbm [shape: f32[2,8,32], index: 5, kind: output, shape index: {}]  }
   0x1   :  { %11 = vsyncpa [#allocation6], 0 }
   0x2   :  { %12 = vsyncpa [#allocation4], 0  ;;  %s1477_s18 = smov [#allocation5]   ;;  %s1383_s22 = scalar_lea.hbm %s1777_s1, 256 }
   0x3   :  { %s30_s19 = sshll.u32 %s1477_s18, 4  ;;  %p1384_p0 = scmp.ne.s32.totalorder %s1777_s1, %s1383_s22  ;;  %s31_s19 = int_to_ptr.vmem [resolvable:$true] %s30_s19 }
   0x4   :  { %p1387_p1 = scmp.lt.u32.totalorder %s1383_s22, %s1777_s1 }
   0x6   :  { %p1389_p2 = pnand %p1387_p1, %p1384_p0 }
   0x8   :  { %1392 = shalt.err (!%p1389_p2)
}
   0x9   :  { %s1393_s27 = scalar_lea.vmem %s31_s19, 256  ;;  %p1398_p4 = scmp.lt.s32.totalorder %s31_s19, %s31_s19 }
   0xa   :  { %p1394_p3 = scmp.ne.s32.totalorder %s31_s19, %s1393_s27  ;;  %p1399_p5 = scmp.lt.s32.totalorder %s1393_s27, %s1393_s27 }
   0xc   :  { %p1400_p6 = por %p1399_p5, %p1398_p4 }
   0xe   :  { %p1401_p7 = pnand %p1400_p6, %p1394_p3 }
  0x10   :  { %1404 = shalt.err (!%p1401_p7)
}
  0x11   :  { %s1478_s28 = smov 64   ;;  %s1479_s29 = smov 4  }
  0x12   :  { %36 = dma.hbm_to_vmem [thread:$0]  %s1777_s1, 256, %s31_s19, [#allocation6], %s1478_s28, %s1478_s28, %s1479_s29  }
  0x13   :  { %s1480_s7 = smov [#allocation2]   ;;  %s1405_s11 = scalar_lea.hbm %s1776_s0, 256 }
  0x14   :  { %s18_s8 = sshll.u32 %s1480_s7, 4  ;;  %p1406_p8 = scmp.ne.s32.totalorder %s1776_s0, %s1405_s11  ;;  %s19_s8 = int_to_ptr.vmem [resolvable:$true] %s18_s8 }
  0x15   :  { %p1409_p9 = scmp.lt.u32.totalorder %s1405_s11, %s1776_s0 }
  0x17   :  { %p1411_p10 = pnand %p1409_p9, %p1406_p8 }
  0x19   :  { %1414 = shalt.err (!%p1411_p10)
}
  0x1a   :  { %s1415_s16 = scalar_lea.vmem %s19_s8, 256  ;;  %p1420_p12 = scmp.lt.s32.totalorder %s19_s8, %s19_s8 }
  0x1b   :  { %p1416_p11 = scmp.ne.s32.totalorder %s19_s8, %s1415_s16  ;;  %p1421_p13 = scmp.lt.s32.totalorder %s1415_s16, %s1415_s16 }
  0x1d   :  { %p1422_p0 = por %p1421_p13, %p1420_p12 }
  0x1f   :  { %p1423_p1 = pnand %p1422_p0, %p1416_p11 }
  0x21   :  { %1426 = shalt.err (!%p1423_p1)
}
  0x22   :  { %s1481_s1 = smov 128   ;;  %s1482_s17 = smov 8  }
  0x23   :  { %24 = dma.hbm_to_vmem [thread:$0]  %s1776_s0, 256, %s19_s8, [#allocation3], %s1481_s1, %s1481_s1, %s1482_s17  }
  0x24   :  { %s1483_s20 = smov [#allocation7]   ;;  %s1427_s24 = scalar_lea.hbm %s1779_s3, 256 }
  0x25   :  { %s44_s21 = sshll.u32 %s1483_s20, 4  ;;  %p1428_p2 = scmp.ne.s32.totalorder %s1779_s3, %s1427_s24  ;;  %s45_s21 = int_to_ptr.vmem [resolvable:$true] %s44_s21 }
  0x26   :  { %p1431_p3 = scmp.lt.u32.totalorder %s1427_s24, %s1779_s3 }
  0x28   :  { %p1433_p4 = pnand %p1431_p3, %p1428_p2 }
  0x2a   :  { %1436 = shalt.err (!%p1433_p4)
}
  0x2b   :  { %s1437_s6 = scalar_lea.vmem %s45_s21, 256  ;;  %p1442_p6 = scmp.lt.s32.totalorder %s45_s21, %s45_s21 }
  0x2c   :  { %p1438_p5 = scmp.ne.s32.totalorder %s45_s21, %s1437_s6  ;;  %p1443_p7 = scmp.lt.s32.totalorder %s1437_s6, %s1437_s6 }
  0x2e   :  { %p1444_p8 = por %p1443_p7, %p1442_p6 }
  0x30   :  { %p1445_p9 = pnand %p1444_p8, %p1438_p5 }
  0x32   :  { %1448 = shalt.err (!%p1445_p9)
}
  0x33   :  { %50 = dma.hbm_to_vmem [thread:$0]  %s1779_s3, 256, %s45_s21, [#allocation6], %s1478_s28, %s1478_s28, %s1479_s29  }
  0x34   :  { %1471 = dma.done.wait [#allocation3], 256  }
  0x35   :  { %1472 = vsyncadd [#allocation3], 4294967040 }
  0x36   :  { %1473 = dma.done.wait [#allocation6], 512  }
  0x37   :  { %1474 = vsyncadd [#allocation6], 4294966784  ;;  %v1484_v0 = vmov 0.0   ;;  %vm1485_vm0 = vmmov 0   ;;  %v1347_v1 = vld [vmem:[#allocation5] sm:$0xff]   ;;  %v1348_v2 = vld [vmem:[#allocation5 + $0x8] sm:$0xff]  }
  0x38   :  { %1198 = vmatprep.subr.bf16.mxu0 %v1484_v0  ;;  %1202 = vmatprep.mubr.msk.bf16.mxu0 %vm1485_vm0, %v1484_v0  ;;  %v63_v3 = vld [vmem:[#allocation2] sm:$0xff]  ;;  %v64_v4 = vld [vmem:[#allocation2 + $0x8] sm:$0xff]  ;;  %vm89_vm1 = vcmask 261120   ;;  %s1486_s8 = smov 96   ;;  %s1487_s9 = smov 88   ;;  %vm139_vm2 = vcmask 64512  }
  0x39   :  { %1206 = vmatprep.subr.bf16.mxu1 %v1484_v0  ;;  %1208 = vmatprep.mubr.msk.bf16.mxu1 %vm1485_vm0, %v1484_v0  ;;  %v65_v5 = vpack.c.bf16 %v64_v4, %v63_v3  ;;  %v1136_v6 = vld [vmem:[%s1778_s2] ss:$0 sm:$0xff]  ;;  %s1488_s2 = smov 120   ;;  %s1489_s10 = smov 56   ;;  %vm260_vm3 = vcmask 1043456   ;;  %vm1042_vm4 = vcmask 130048  }
  0x3a   :  { %1199 = vmatpush3.bf16.msra.mxu0 %v1347_v1  ;;  %s1491_s11 = smov 112   ;;  %s1492_s12 = smov 48   ;;  %vm1045_vm5 = vcmask 195584  }
  0x3b   :  { %1200 = vmatprep.subr.bf16.mxu0 %v1484_v0  ;;  %s1493_s13 = smov 72   ;;  %s1494_s14 = smov 104  }
  0x3c   :  { %s1495_s15 = smov 40   ;;  %s1496_s16 = smov 16  }
  0x3d   :  { %s1497_s18 = smov 24   ;;  %s1498_s21 = smov [#allocation8]  }
  0x3e   :  { %1201 = vmatpush3.bf16.msra.mxu0 %v1348_v2  ;;  %s1123_s22 = sshll.u32 %s1498_s21, 4  ;;  %s1124_s22 = int_to_ptr.vmem [resolvable:$true] %s1123_s22 }
  0x3f   :  { %1212 = vmatprep.subr.bf16.mxu0 %v1484_v0  ;;  %s1449_s23 = scalar_lea.vmem %s1124_s22, 256  ;;  %p1454_p11 = scmp.lt.s32.totalorder %s1124_s22, %s1124_s22 }
  0x40   :  { %p1450_p10 = scmp.ne.s32.totalorder %s1124_s22, %s1449_s23  ;;  %p1455_p12 = scmp.lt.s32.totalorder %s1449_s23, %s1449_s23 }
  0x41   :  { %1203 = vmatmul.mubr.msk.bf16.vlgmr.msra.gmra.mrb[0].mxu0 %vm89_vm1, %v65_v5 }
  0x42   :  { %1214 = vmatprep.mubr.msk.bf16.mxu0 %vm1485_vm0, %v1484_v0  ;;  %p1456_p13 = por %p1455_p12, %p1454_p11 }
  0x44   :  { %p1457_p0 = pnand %p1456_p13, %p1450_p10 }
 0x114   :  { %v127_v7 = vpop.f32.mrb[0].mxu0 }
 0x115   :  { %v128_v8 = vadd.f32 %v1136_v6, %v127_v7  ;;  %v1204_v9 = vpop.f32.mrb[1].mxu0 }
 0x116   :  { %v130_v10 = vpop.f32.mrb[2].mxu0 }
 0x117   :  { %v1588_v11 = vpack.c.bf16 %v128_v8, %v128_v8  ;;  %v131_v12 = vadd.f32 %v1136_v6, %v130_v10  ;;  %v1205_v13 = vpop.f32.mrb[3].mxu0 }
 0x119   :  { %137 = vrot.lane.b32.xlu0 %v1588_v11, %s1486_s8  ;;  %v1591_v14 = vpack.c.bf16 %v131_v12, %v131_v12 }
 0x11d   :  { %187 = vrot.lane.b32.xlu0 %v1591_v14, %s1486_s8 }
 0x121   :  { %255 = vrot.lane.b32.xlu0 %v1588_v11, %s1478_s28 }
 0x125   :  { %358 = vrot.lane.b32.xlu0 %v1588_v11, %s1487_s9 }
 0x129   :  { %408 = vrot.lane.b32.xlu0 %v1591_v14, %s1487_s9 }
 0x12d   :  { %356 = vrot.lane.b32.xlu0 %v1588_v11, %s1488_s2 }
 0x131   :  { %406 = vrot.lane.b32.xlu0 %v1591_v14, %s1488_s2 }
 0x135   :  { %476 = vrot.lane.b32.xlu0 %v1588_v11, %s1489_s10 }
 0x18b   :  { %v138_v15 = vpop.permute.xlu0 %137 }
 0x18c   :  { %v144_v16 = vsel %vm139_vm2, %v138_v15, 0 }
 0x18d   :  { %1207 = vmatpush3.bf16.xpose.msra.mxu1 %v144_v16 }
 0x18e   :  { %1218 = vmatprep.subr.bf16.mxu1 %v1484_v0 }
 0x18f   :  { %v188_v17 = vpop.permute.xlu0 %187 }
 0x190   :  { %v193_v18 = vsel %vm139_vm2, %v188_v17, 0 }
 0x191   :  { %1213 = vmatpush3.bf16.xpose.msra.mxu0 %v193_v18 }
 0x192   :  { %1224 = vmatprep.subr.bf16.mxu0 %v1484_v0 }
 0x193   :  { %v256_v19 = vpop.permute.xlu0 %255 }
 0x194   :  { %v262_v20 = vsel %vm260_vm3, %v256_v19, 0  ;;  %1209 = vmatmul.mubr.msk.bf16.vlgmr.msra.gmra.mrb[0].mxu1 %vm139_vm2, %v1588_v11 }
 0x195   :  { %1219 = vmatpush3.bf16.msra.mxu1 %v262_v20  ;;  %1220 = vmatprep.mubr.msk.bf16.mxu1 %vm1485_vm0, %v1484_v0 }
 0x196   :  { %1230 = vmatprep.subr.bf16.mxu1 %v1484_v0 }
 0x197   :  { %v359_v31 = vpop.permute.xlu0 %358 }
 0x198   :  { %1215 = vmatmul.mubr.msk.bf16.vlgmr.msra.gmra.mrb[4].mxu0 %vm139_vm2, %v1591_v14  ;;  %v364_v45 = vsel %vm139_vm2, %v359_v31, 0 }
 0x199   :  { %1226 = vmatprep.mubr.msk.bf16.mxu0 %vm1485_vm0, %v1484_v0 }
 0x19b   :  { %v409_v36 = vpop.permute.xlu0 %408 }
 0x19c   :  { %v414_v48 = vsel %vm139_vm2, %v409_v36, 0 }
 0x19f   :  { %v357_v41 = vpop.permute.xlu0 %356 }
 0x1a3   :  { %v407_v44 = vpop.permute.xlu0 %406 }
 0x1a7   :  { %v477_v49 = vpop.permute.xlu0 %476 }
 0x1a8   :  { %v482_v50 = vsel %vm260_vm3, %v477_v49, 0 }
 0x267   :  { %v180_v21 = vpop.f32.mrb[0].mxu1 }
 0x268   :  { %v1210_v22 = vpop.f32.mrb[1].mxu1  ;;  %v235_v23 = vsel %vm139_vm2, %v180_v21, -inf }
 0x269   :  { %236 = vmax.xlane.f32.xlu1 %v235_v23  ;;  %v183_v24 = vpop.f32.mrb[2].mxu1 }
 0x26a   :  { %v1211_v25 = vpop.f32.mrb[3].mxu1 }
 0x26b   :  { %v229_v26 = vpop.f32.mrb[4].mxu0 }
 0x26c   :  { %v1216_v27 = vpop.f32.mrb[5].mxu0  ;;  %v238_v28 = vsel %vm139_vm2, %v229_v26, -inf }
 0x26d   :  { %239 = vmax.xlane.f32.xlu1 %v238_v28  ;;  %v232_v29 = vpop.f32.mrb[6].mxu0 }
 0x26e   :  { %v1217_v30 = vpop.f32.mrb[7].mxu0 }
 0x27e   :  { %304 = vrot.lane.b32.xlu1 %v1591_v14, %s1478_s28  ;;  %s1490_s28 = smov 80  }
 0x282   :  { %524 = vrot.lane.b32.xlu1 %v1591_v14, %s1489_s10 }
 0x2f6   :  { %v237_v32 = vpop.xlane.xlu1 %236 }
 0x2f7   :  { %v241_v33 = vsub.f32 %v180_v21, %v237_v32 }
 0x2f9   :  { %v243_v34 = vmul.f32 1.442695, %v241_v33 }
 0x2fa   :  { %v240_v35 = vpop.xlane.xlu1 %239 }
 0x2fb   :  { %1351 = vpow2.f32 %v243_v34  ;;  %v242_v37 = vsub.f32 %v229_v26, %v240_v35 }
 0x2fd   :  { %v245_v38 = vmul.f32 1.442695, %v242_v37 }
 0x2fe   :  { %v305_v39 = vpop.permute.xlu1 %304 }
 0x2ff   :  { %1353 = vpow2.f32 %v245_v38  ;;  %v310_v40 = vsel %vm260_vm3, %v305_v39, 0 }
 0x300   :  { %1225 = vmatpush3.bf16.msra.mxu0 %v310_v40 }
 0x301   :  { %1236 = vmatprep.subr.bf16.mxu0 %v1484_v0 }
 0x302   :  { %v525_v51 = vpop.permute.xlu1 %524 }
 0x303   :  { %v530_v52 = vsel %vm260_vm3, %v525_v51, 0 }
 0x305   :  { %v1624_v42 = vpop.eup %1351 }
 0x306   :  { %v253_v43 = vpack.c.bf16 %v1624_v42, %v1624_v42 }
 0x308   :  { %1221 = vmatmul.mubr.msk.bf16.vlgmr.msra.gmra.mrb[4].mxu1 %vm139_vm2, %v253_v43 }
 0x309   :  { %v1630_v46 = vpop.eup %1353  ;;  %1231 = vmatpush3.bf16.xpose.msra.mxu1 %v364_v45  ;;  %1232 = vmatprep.mubr.msk.bf16.mxu1 %vm1485_vm0, %v1484_v0 }
 0x30a   :  { %v254_v47 = vpack.c.bf16 %v1630_v46, %v1630_v46  ;;  %1242 = vmatprep.subr.bf16.mxu1 %v1484_v0 }
 0x30c   :  { %1227 = vmatmul.mubr.msk.bf16.vlgmr.msra.gmra.mrb[8].mxu0 %vm139_vm2, %v254_v47 }
 0x30d   :  { %1237 = vmatpush3.bf16.xpose.msra.mxu0 %v414_v48  ;;  %1238 = vmatprep.mubr.msk.bf16.mxu0 %vm1485_vm0, %v1484_v0 }
 0x30e   :  { %1248 = vmatprep.subr.bf16.mxu0 %v1484_v0 }
 0x310   :  { %1233 = vmatmul.mubr.msk.bf16.vlgmr.msra.gmra.mrb[8].mxu1 %vm139_vm2, %v357_v41 }
 0x311   :  { %1243 = vmatpush3.bf16.msra.mxu1 %v482_v50  ;;  %1244 = vmatprep.mubr.msk.bf16.mxu1 %vm1485_vm0, %v1484_v0 }
 0x312   :  { %1254 = vmatprep.subr.bf16.mxu1 %v1484_v0 }
 0x314   :  { %1239 = vmatmul.mubr.msk.bf16.vlgmr.msra.gmra.mrb[12].mxu0 %vm139_vm2, %v407_v44 }
 0x315   :  { %1249 = vmatpush3.bf16.msra.mxu0 %v530_v52  ;;  %1250 = vmatprep.mubr.msk.bf16.mxu0 %vm1485_vm0, %v1484_v0 }
 0x316   :  { %1260 = vmatprep.subr.bf16.mxu0 %v1484_v0 }
 0x3db   :  { %v1652_v53 = vpop.f32.mrb[4].mxu1 }
 0x3dc   :  { %v1222_v54 = vpop.f32.mrb[5].mxu1 }
 0x3dd   :  { %v301_v55 = vpop.f32.mrb[6].mxu1 }
 0x3de   :  { %v1223_v56 = vpop.f32.mrb[7].mxu1 }
 0x3df   :  { %v1654_v57 = vpop.f32.mrb[8].mxu0 }
 0x3e0   :  { %v1228_v58 = vpop.f32.mrb[9].mxu0 }
 0x3e1   :  { %v349_v59 = vpop.f32.mrb[10].mxu0 }
 0x3e2   :  { %v1229_v60 = vpop.f32.mrb[11].mxu0 }
 0x3e3   :  { %v400_v61 = vpop.f32.mrb[8].mxu1 }
 0x3e4   :  { %v1234_v62 = vpop.f32.mrb[9].mxu1  ;;  %v456_v63 = vsel %vm139_vm2, %v400_v61, -inf }
 0x3e5   :  { %v403_v1 = vpop.f32.mrb[10].mxu1  ;;  %457 = vmax.xlane.f32.xlu1 %v456_v63 }
 0x3e6   :  { %v1235_v2 = vpop.f32.mrb[11].mxu1 }
 0x3e7   :  { %v450_v3 = vpop.f32.mrb[12].mxu0 }
 0x3e8   :  { %v1240_v4 = vpop.f32.mrb[13].mxu0  ;;  %v459_v5 = vsel %vm139_vm2, %v450_v3, -inf }
 0x3e9   :  { %460 = vmax.xlane.f32.xlu0 %v459_v5  ;;  %v453_v6 = vpop.f32.mrb[14].mxu0 }
 0x3ea   :  { %v1241_v7 = vpop.f32.mrb[15].mxu0 }
 0x3f6   :  { %578 = vrot.lane.b32.xlu1 %v1588_v11, %s1490_s28 }
 0x3fa   :  { %576 = vrot.lane.b32.xlu1 %v1588_v11, %s1491_s11 }
 0x3fe   :  { %744 = vrot.lane.b32.xlu1 %v1591_v14, %s1492_s12 }
 0x3ff   :  { %628 = vrot.lane.b32.xlu0 %v1591_v14, %s1490_s28 }
 0x403   :  { %626 = vrot.lane.b32.xlu0 %v1591_v14, %s1491_s11 }
 0x407   :  { %696 = vrot.lane.b32.xlu0 %v1588_v11, %s1492_s12 }
 0x472   :  { %v458_v8 = vpop.xlane.xlu1 %457 }
 0x473   :  { %v462_v9 = vsub.f32 %v400_v61, %v458_v8 }
 0x475   :  { %v464_v10 = vmul.f32 1.442695, %v462_v9 }
 0x476   :  { %v461_v12 = vpop.xlane.xlu0 %460  ;;  %v579_v18 = vpop.permute.xlu1 %578 }
 0x477   :  { %1355 = vpow2.f32 %v464_v10  ;;  %v463_v13 = vsub.f32 %v450_v3, %v461_v12  ;;  %v584_v21 = vsel %vm139_vm2, %v579_v18, 0 }
 0x479   :  { %v466_v15 = vmul.f32 1.442695, %v463_v13 }
 0x47a   :  { %v629_v16 = vpop.permute.xlu0 %628  ;;  %v577_v24 = vpop.permute.xlu1 %576 }
 0x47b   :  { %1357 = vpow2.f32 %v466_v15  ;;  %v634_v25 = vsel %vm139_vm2, %v629_v16, 0 }
 0x47e   :  { %v627_v20 = vpop.permute.xlu0 %626  ;;  %v745_v28 = vpop.permute.xlu1 %744 }
 0x47f   :  { %v750_v29 = vsel %vm260_vm3, %v745_v28, 0 }
 0x481   :  { %v1664_v17 = vpop.eup %1355 }
 0x482   :  { %v474_v19 = vpack.c.bf16 %v1664_v17, %v1664_v17  ;;  %v697_v26 = vpop.permute.xlu0 %696 }
 0x483   :  { %v702_v27 = vsel %vm260_vm3, %v697_v26, 0 }
 0x484   :  { %1245 = vmatmul.mubr.msk.bf16.vlgmr.msra.gmra.mrb[12].mxu1 %vm139_vm2, %v474_v19 }
 0x485   :  { %v1670_v22 = vpop.eup %1357  ;;  %1255 = vmatpush3.bf16.xpose.msra.mxu1 %v584_v21  ;;  %1256 = vmatprep.mubr.msk.bf16.mxu1 %vm1485_vm0, %v1484_v0 }
 0x486   :  { %v475_v23 = vpack.c.bf16 %v1670_v22, %v1670_v22  ;;  %1266 = vmatprep.subr.bf16.mxu1 %v1484_v0 }
 0x488   :  { %1251 = vmatmul.mubr.msk.bf16.vlgmr.msra.gmra.mrb[16].mxu0 %vm139_vm2, %v475_v23 }
 0x489   :  { %1261 = vmatpush3.bf16.xpose.msra.mxu0 %v634_v25  ;;  %1262 = vmatprep.mubr.msk.bf16.mxu0 %vm1485_vm0, %v1484_v0 }
 0x48a   :  { %1272 = vmatprep.subr.bf16.mxu0 %v1484_v0 }
 0x48c   :  { %1257 = vmatmul.mubr.msk.bf16.vlgmr.msra.gmra.mrb[16].mxu1 %vm139_vm2, %v577_v24 }
 0x48d   :  { %1267 = vmatpush3.bf16.msra.mxu1 %v702_v27  ;;  %1268 = vmatprep.mubr.msk.bf16.mxu1 %vm1485_vm0, %v1484_v0  ;;  %v468_v27 = vsel %vm139_vm2, %v1664_v17, 0.0 }
 0x48e   :  { %1278 = vmatprep.subr.bf16.mxu1 %v1484_v0 }
 0x490   :  { %1263 = vmatmul.mubr.msk.bf16.vlgmr.msra.gmra.mrb[20].mxu0 %vm139_vm2, %v627_v20 }
 0x491   :  { %1273 = vmatpush3.bf16.msra.mxu0 %v750_v29  ;;  %1274 = vmatprep.mubr.msk.bf16.mxu0 %vm1485_vm0, %v1484_v0  ;;  %v471_v29 = vsel %vm139_vm2, %v1670_v22, 0.0 }
 0x492   :  { %1284 = vmatprep.subr.bf16.mxu0 %v1484_v0 }
 0x557   :  { %v1692_v30 = vpop.f32.mrb[12].mxu1 }
 0x558   :  { %v1246_v31 = vpop.f32.mrb[13].mxu1 }
 0x559   :  { %v521_v32 = vpop.f32.mrb[14].mxu1 }
 0x55a   :  { %v1247_v33 = vpop.f32.mrb[15].mxu1 }
 0x55b   :  { %v1694_v34 = vpop.f32.mrb[16].mxu0 }
 0x55c   :  { %v1252_v35 = vpop.f32.mrb[17].mxu0 }
 0x55d   :  { %v569_v36 = vpop.f32.mrb[18].mxu0 }
 0x55e   :  { %v1253_v37 = vpop.f32.mrb[19].mxu0 }
 0x55f   :  { %v620_v38 = vpop.f32.mrb[16].mxu1 }
 0x560   :  { %v1258_v39 = vpop.f32.mrb[17].mxu1  ;;  %v676_v40 = vsel %vm139_vm2, %v620_v38, -inf }
 0x561   :  { %677 = vmax.xlane.f32.xlu1 %v676_v40  ;;  %v623_v41 = vpop.f32.mrb[18].mxu1 }
 0x562   :  { %v1259_v43 = vpop.f32.mrb[19].mxu1 }
 0x563   :  { %v670_v44 = vpop.f32.mrb[20].mxu0 }
 0x564   :  { %v1264_v45 = vpop.f32.mrb[21].mxu0  ;;  %v679_v47 = vsel %vm139_vm2, %v670_v44, -inf }
 0x565   :  { %680 = vmax.xlane.f32.xlu0 %v679_v47  ;;  %v673_v48 = vpop.f32.mrb[22].mxu0 }
 0x566   :  { %v1265_v49 = vpop.f32.mrb[23].mxu0  ;;  %v250_v48 = vsel %vm139_vm2, %v1630_v46, 0.0 }
 0x572   :  { %798 = vrot.lane.b32.xlu1 %v1588_v11, %s1493_s13 }
 0x576   :  { %796 = vrot.lane.b32.xlu1 %v1588_v11, %s1494_s14 }
 0x57b   :  { %848 = vrot.lane.b32.xlu0 %v1591_v14, %s1493_s13 }
 0x57f   :  { %846 = vrot.lane.b32.xlu0 %v1591_v14, %s1494_s14 }
 0x5ee   :  { %v678_v50 = vpop.xlane.xlu1 %677 }
 0x5ef   :  { %v682_v51 = vsub.f32 %v620_v38, %v678_v50 }
 0x5f1   :  { %v684_v52 = vmul.f32 1.442695, %v682_v51 }
 0x5f2   :  { %v681_v54 = vpop.xlane.xlu0 %680  ;;  %v799_v59 = vpop.permute.xlu1 %798 }
 0x5f3   :  { %1359 = vpow2.f32 %v684_v52  ;;  %v683_v55 = vsub.f32 %v670_v44, %v681_v54  ;;  %v804_v61 = vsel %vm139_vm2, %v799_v59, 0  ;;  %v247_v44 = vsel %vm139_vm2, %v1624_v42, 0.0 }
 0x5f5   :  { %v686_v56 = vmul.f32 1.442695, %v683_v55 }
 0x5f6   :  { %v849_v63 = vpop.permute.xlu0 %848  ;;  %v797_v3 = vpop.permute.xlu1 %796 }
 0x5f7   :  { %1361 = vpow2.f32 %v686_v56  ;;  %v854_v2 = vsel %vm139_vm2, %v849_v63, 0  ;;  %v1349_v63 = vld [vmem:[#allocation7] sm:$0xff]  }
 0x5fa   :  { %v847_v4 = vpop.permute.xlu0 %846 }
 0x5fd   :  { %v1360_v58 = vpop.eup %1359 }
 0x5fe   :  { %v694_v60 = vpack.c.bf16 %v1360_v58, %v1360_v58  ;;  %v688_v31 = vsel %vm139_vm2, %v1360_v58, 0.0 }
 0x600   :  { %1269 = vmatmul.mubr.msk.bf16.vlgmr.msra.gmra.mrb[20].mxu1 %vm139_vm2, %v694_v60 }
 0x601   :  { %v1362_v62 = vpop.eup %1361  ;;  %1279 = vmatpush3.bf16.xpose.msra.mxu1 %v804_v61  ;;  %1280 = vmatprep.mubr.msk.bf16.mxu1 %vm1485_vm0, %v1484_v0 }
 0x602   :  { %v695_v1 = vpack.c.bf16 %v1362_v62, %v1362_v62  ;;  %1290 = vmatprep.subr.bf16.mxu1 %v1484_v0  ;;  %v691_v28 = vsel %vm139_vm2, %v1362_v62, 0.0 }
 0x604   :  { %1275 = vmatmul.mubr.msk.bf16.vlgmr.msra.gmra.mrb[24].mxu0 %vm139_vm2, %v695_v1 }
 0x605   :  { %1285 = vmatpush3.bf16.xpose.msra.mxu0 %v854_v2  ;;  %1286 = vmatprep.mubr.msk.bf16.mxu0 %vm1485_vm0, %v1484_v0 }
 0x606   :  { %1296 = vmatprep.subr.bf16.mxu0 %v1484_v0 }
 0x608   :  { %1281 = vmatmul.mubr.msk.bf16.vlgmr.msra.gmra.mrb[24].mxu1 %vm139_vm2, %v797_v3 }
 0x609   :  { %1292 = vmatprep.mubr.msk.bf16.mxu1 %vm1485_vm0, %v1484_v0 }
 0x60c   :  { %1287 = vmatmul.mubr.msk.bf16.vlgmr.msra.gmra.mrb[28].mxu0 %vm139_vm2, %v847_v4 }
 0x60d   :  { %1298 = vmatprep.mubr.msk.bf16.mxu0 %vm1485_vm0, %v1484_v0 }
 0x6d3   :  { %v1718_v5 = vpop.f32.mrb[20].mxu1 }
 0x6d4   :  { %v1270_v6 = vpop.f32.mrb[21].mxu1 }
 0x6d5   :  { %v741_v7 = vpop.f32.mrb[22].mxu1 }
 0x6d6   :  { %v1271_v8 = vpop.f32.mrb[23].mxu1 }
 0x6d7   :  { %v1720_v9 = vpop.f32.mrb[24].mxu0 }
 0x6d8   :  { %v1276_v10 = vpop.f32.mrb[25].mxu0 }
 0x6d9   :  { %v789_v12 = vpop.f32.mrb[26].mxu0 }
 0x6da   :  { %v1277_v13 = vpop.f32.mrb[27].mxu0 }
 0x6db   :  { %v840_v15 = vpop.f32.mrb[24].mxu1 }
 0x6dc   :  { %v1282_v16 = vpop.f32.mrb[25].mxu1  ;;  %v896_v18 = vsel %vm139_vm2, %v840_v15, -inf }
 0x6dd   :  { %897 = vmax.xlane.f32.xlu1 %v896_v18  ;;  %v843_v19 = vpop.f32.mrb[26].mxu1 }
 0x6de   :  { %v1283_v20 = vpop.f32.mrb[27].mxu1 }
 0x6df   :  { %v890_v21 = vpop.f32.mrb[28].mxu0 }
 0x6e0   :  { %v1288_v23 = vpop.f32.mrb[29].mxu0  ;;  %v899_v24 = vsel %vm139_vm2, %v890_v21, -inf }
 0x6e1   :  { %900 = vmax.xlane.f32.xlu0 %v899_v24  ;;  %v893_v25 = vpop.f32.mrb[30].mxu0 }
 0x6e2   :  { %v1289_v26 = vpop.f32.mrb[31].mxu0 }
 0x6ee   :  { %964 = vrot.lane.b32.xlu1 %v1591_v14, %s1495_s15 }
 0x6f7   :  { %916 = vrot.lane.b32.xlu0 %v1588_v11, %s1495_s15 }
 0x712   :  { %469 = vadd.xlane.f32.xlu1 %v468_v27 }
 0x716   :  { %692 = vadd.xlane.f32.xlu1 %v691_v28  ;;  %472 = vadd.xlane.f32.xlu0 %v471_v29 }
 0x71a   :  { %689 = vadd.xlane.f32.xlu0 %v688_v31 }
 0x76a   :  { %v898_v32 = vpop.xlane.xlu1 %897 }
 0x76b   :  { %v902_v33 = vsub.f32 %v840_v15, %v898_v32 }
 0x76d   :  { %v904_v35 = vmul.f32 1.442695, %v902_v33 }
 0x76e   :  { %v965_v14 = vpop.permute.xlu1 %964  ;;  %v901_v36 = vpop.xlane.xlu0 %900 }
 0x76f   :  { %1363 = vpow2.f32 %v904_v35  ;;  %v970_v11 = vsel %vm260_vm3, %v965_v14, 0  ;;  %v903_v17 = vsub.f32 %v890_v21, %v901_v36 }
 0x770   :  { %1297 = vmatpush3.bf16.msra.mxu0 %v970_v11 }
 0x771   :  { %v906_v37 = vmul.f32 1.442695, %v903_v17 }
 0x772   :  { %v917_v38 = vpop.permute.xlu0 %916 }
 0x773   :  { %1365 = vpow2.f32 %v906_v37  ;;  %v922_v22 = vsel %vm260_vm3, %v917_v38, 0 }
 0x774   :  { %1291 = vmatpush3.bf16.msra.mxu1 %v922_v22 }
 0x775   :  { %1302 = vmatprep.subr.bf16.mxu1 %v1484_v0 }
 0x779   :  { %v1364_v39 = vpop.eup %1363 }
 0x77a   :  { %v908_v40 = vsel %vm139_vm2, %v1364_v39, 0.0  ;;  %v914_v41 = vpack.c.bf16 %v1364_v39, %v1364_v39 }
 0x77b   :  { %909 = vadd.xlane.f32.xlu0 %v908_v40 }
 0x77c   :  { %1293 = vmatmul.mubr.msk.bf16.vlgmr.msra.gmra.mrb[28].mxu1 %vm139_vm2, %v914_v41 }
 0x77d   :  { %v1366_v43 = vpop.eup %1365  ;;  %1306 = vmatprep.mubr.msk.bf16.mxu1 %vm1485_vm0, %v1484_v0  ;;  %1303 = vmatpush3.bf16.msra.mxu1 %v1349_v63 }
 0x77e   :  { %v911_v45 = vsel %vm139_vm2, %v1366_v43, 0.0  ;;  %v915_v47 = vpack.c.bf16 %v1366_v43, %v1366_v43  ;;  %1304 = vmatprep.subr.bf16.mxu1 %v1484_v0 }
 0x77f   :  { %248 = vadd.xlane.f32.xlu0 %v247_v44  ;;  %912 = vadd.xlane.f32.xlu1 %v911_v45 }
 0x780   :  { %1299 = vmatmul.mubr.msk.bf16.vlgmr.msra.gmra.mrb[32].mxu0 %vm139_vm2, %v915_v47 }
 0x783   :  { %251 = vadd.xlane.f32.xlu1 %v250_v48 }
 0x79f   :  { %v470_v49 = vpop.xlane.xlu1 %469 }
 0x7a0   :  { %1367 = vrcp.f32 %v470_v49 }
 0x7a3   :  { %v693_v50 = vpop.xlane.xlu1 %692  ;;  %v473_v51 = vpop.xlane.xlu0 %472 }
 0x7a4   :  { %1369 = vrcp.f32 %v473_v51 }
 0x7a5   :  { %1371 = vrcp.f32 %v693_v50 }
 0x7a7   :  { %v690_v52 = vpop.xlane.xlu0 %689 }
 0x7a8   :  { %1373 = vrcp.f32 %v690_v52 }
 0x7aa   :  { %v1368_v42 = vpop.eup %1367 }
 0x7ab   :  { %v574_v56 = vmul.f32 %v1368_v42, %v1692_v30  ;;  %v1350_v30 = vld [vmem:[#allocation7 + $0x8] sm:$0xff]  }
 0x7ac   :  { %1305 = vmatpush3.bf16.msra.mxu1 %v1350_v30 }
 0x7ae   :  { %v1370_v54 = vpop.eup %1369 }
 0x7af   :  { %v1372_v55 = vpop.eup %1371  ;;  %v575_v58 = vmul.f32 %v1370_v54, %v1694_v34 }
 0x7b0   :  { %v795_v61 = vmul.f32 %v1372_v55, %v1720_v9 }
 0x7b1   :  { %v1332_v60 = vpack.i.bf16 %v575_v58, %v574_v56 }
 0x7b2   :  { %v1374_v59 = vpop.eup %1373 }
 0x7b3   :  { %v794_v46 = vmul.f32 %v1374_v59, %v1718_v5  ;;  %1333 = vrot.lane.b32.xlu0 %v1332_v60, %s1482_s17 }
 0x7b5   :  { %v1337_v62 = vpack.i.bf16 %v795_v61, %v794_v46 }
 0x7b7   :  { %1338 = vrot.lane.b32.xlu1 %v1337_v62, %s1496_s16 }
 0x808   :  { %v910_v1 = vpop.xlane.xlu0 %909 }
 0x809   :  { %1375 = vrcp.f32 %v910_v1 }
 0x80c   :  { %v913_v2 = vpop.xlane.xlu1 %912  ;;  %v249_v0 = vpop.xlane.xlu0 %248 }
 0x80d   :  { %1377 = vrcp.f32 %v913_v2 }
 0x80e   :  { %1379 = vrcp.f32 %v249_v0 }
 0x810   :  { %v252_v18 = vpop.xlane.xlu1 %251 }
 0x811   :  { %1381 = vrcp.f32 %v252_v18 }
 0x813   :  { %v1376_v5 = vpop.eup %1375 }
 0x817   :  { %v1378_v7 = vpop.eup %1377 }
 0x818   :  { %v1380_v20 = vpop.eup %1379 }
 0x819   :  { %v354_v28 = vmul.f32 %v1380_v20, %v1652_v53  ;;  %v1156_v53 = vld [vmem:[%s1780_s4] ss:$0 sm:$0xff] }
 0x81b   :  { %v1382_v23 = vpop.eup %1381 }
 0x81c   :  { %v355_v29 = vmul.f32 %v1382_v23, %v1654_v57 }
 0x825   :  { %v1334_v19 = vpop.permute.xlu0 %1333 }
 0x826   :  { %v1336_v24 = vunpack.i.h.bf16 %v1334_v19  ;;  %v1335_v25 = vunpack.i.l.bf16 %v1334_v19 }
 0x828   :  { %v1041_v32 = vsel %vm139_vm2, %v355_v29, %v1336_v24  ;;  %v1040_v33 = vsel %vm139_vm2, %v354_v28, %v1335_v25 }
 0x829   :  { %v1339_v21 = vpop.permute.xlu1 %1338 }
 0x82a   :  { %v1341_v26 = vunpack.i.h.bf16 %v1339_v21  ;;  %v1340_v27 = vunpack.i.l.bf16 %v1339_v21 }
 0x82c   :  { %v1043_v36 = vsel %vm1042_vm4, %v1040_v33, %v1340_v27  ;;  %v1044_v11 = vsel %vm1042_vm4, %v1041_v32, %v1341_v26 }
 0x84f   :  { %v958_v34 = vpop.f32.mrb[28].mxu1 }
 0x850   :  { %v1294_v3 = vpop.f32.mrb[29].mxu1  ;;  %v1014_v9 = vmul.f32 %v1376_v5, %v958_v34 }
 0x851   :  { %v961_v4 = vpop.f32.mrb[30].mxu1 }
 0x852   :  { %v1295_v6 = vpop.f32.mrb[31].mxu1 }
 0x853   :  { %v1006_v8 = vpop.f32.mrb[32].mxu0 }
 0x854   :  { %v1015_v10 = vmul.f32 %v1378_v7, %v1006_v8  ;;  %v1300_v12 = vpop.f32.mrb[33].mxu0 }
 0x855   :  { %v1009_v13 = vpop.f32.mrb[34].mxu0 }
 0x856   :  { %v1342_v15 = vpack.i.bf16 %v1015_v10, %v1014_v9  ;;  %v1301_v16 = vpop.f32.mrb[35].mxu0 }
 0x858   :  { %1343 = vrot.lane.b32.xlu1 %v1342_v15, %s1497_s18 }
 0x8ca   :  { %v1344_v31 = vpop.permute.xlu1 %1343 }
 0x8cb   :  { %v1346_v35 = vunpack.i.h.bf16 %v1344_v31  ;;  %v1345_v14 = vunpack.i.l.bf16 %v1344_v31 }
 0x8cd   :  { %v1047_v17 = vsel %vm1045_vm5, %v1044_v11, %v1346_v35  ;;  %v1046_v37 = vsel %vm1045_vm5, %v1043_v36, %v1345_v14 }
 0x8ce   :  { %v1048_v38 = vpack.c.bf16 %v1047_v17, %v1046_v37 }
 0x8d0   :  { %1307 = vmatmul.mubr.msk.bf16.vlgmr.msra.gmra.mrb[32].mxu1 %vm89_vm1, %v1048_v38 }
 0x9a3   :  { %v1109_v57 = vpop.f32.mrb[32].mxu1 }
 0x9a4   :  { %v1110_v22 = vadd.f32 %v1156_v53, %v1109_v57  ;;  %v1308_v39 = vpop.f32.mrb[33].mxu1 }
 0x9a5   :  { %v1112_v40 = vpop.f32.mrb[34].mxu1 }
 0x9a6   :  { %1116 = vst.msk [vmem:[#allocation8] sm:$0xff] %vm89_vm1, %v1110_v22  ;;  %v1113_v41 = vadd.f32 %v1156_v53, %v1112_v40  ;;  %v1309_v43 = vpop.f32.mrb[35].mxu1 }
 0x9a8   :  { %1117 = vst.msk [vmem:[#allocation8 + $0x8] sm:$0xff] %vm89_vm1, %v1113_v41 }
 0x9a9   :  { %1460 = shalt.err (!%p1457_p0)
}
 0x9aa   :  { %s1461_s25 = scalar_lea.hbm %s1781_s5, 256 }
 0x9ab   :  { %p1462_p1 = scmp.ne.s32.totalorder %s1781_s5, %s1461_s25  ;;  %p1465_p2 = scmp.lt.u32.totalorder %s1461_s25, %s1781_s5 }
 0x9ad   :  { %p1467_p3 = pnand %p1465_p2, %p1462_p1 }
 0x9af   :  { %1470 = shalt.err (!%p1467_p3)
}
 0x9b0   :  { %1129 = dma.vmem_to_hbm [thread:$0]  %s1124_s22, 256, %s1781_s5, [#allocation4], %s1481_s1, %s1481_s1, %s1482_s17  }
 0x9b1   :  { %1475 = dma.done.wait [#allocation4], 256  }
 0x9b2   :  { %1476 = vsyncadd [#allocation4], 4294967040 }
 0x9b3   :  { %1133 = vsyncpa [#allocation3], 1 }
 0x9b4   :  { %1134 = vsyncpa [#allocation6], 1 }
 0x9b5   :  { %1135 = vsyncpa [#allocation4], 1 }

</bundles_post_ra>
